<compile_context>
chip_gen: v7x
topology: tpu7x:2x2x1
jax: 0.10.0
libtpu: 0.0.40
codegen_flags: <defaults>
</compile_context>

<pallas_src>
import math
import functools

import jax
import jax.numpy as jnp
from jax.experimental import pallas as pl
from jax.experimental.pallas import tpu as pltpu


# ----------------------------------------------------------------------------
# pe buffer (equivalent to the register_buffer computed in __init__)
# ----------------------------------------------------------------------------
def make_positional_encoding(max_len, d_model, dtype=jnp.float32):
    position = jnp.arange(max_len, dtype=jnp.float32)[:, None]          # (L, 1)
    div_term = jnp.exp(jnp.arange(0, d_model, 2, dtype=jnp.float32)
                       * (-math.log(10000.0) / d_model))                # (D/2,)
    ang = position * div_term                                           # (L, D/2)
    pe = jnp.zeros((max_len, d_model), jnp.float32)
    pe = pe.at[:, 0::2].set(jnp.sin(ang))
    pe = pe.at[:, 1::2].set(jnp.cos(ang))
    return pe.astype(dtype)


# ----------------------------------------------------------------------------
# Kernels
# ----------------------------------------------------------------------------
def _add_pe_kernel(x_ref, pe_ref, o_ref):
    """Eval mode: out = x + pe (dropout is identity). Computed in x.dtype."""
    # x: (Bb, ts, D), pe: (ts, D) -> broadcasts over the batch rows of the block.
    o_ref[...] = (x_ref[...] + pe_ref[...]).astype(o_ref.dtype)


def _dropout_threshold(p_drop):
    # keep element iff bits >= p * 2^32  (keep prob ~= 1 - p)
    return jnp.uint32(min(int(round(float(p_drop) * 2.0 ** 32)), 2 ** 32 - 1))


def _add_pe_dropout_hw_kernel(seed_ref, x_ref, pe_ref, o_ref, *, p_drop):
    """Training mode on TPU: fused dropout via the hardware PRNG."""
    y = x_ref[...] + pe_ref[...]
    s = pl.program_id(0)
    b = pl.program_id(1)
    block_id = s * pl.num_programs(1) + b
    # Mix the block id with a large odd constant so per-block streams are
    # decorrelated and independent of grid order / TensorCore assignment.
    pltpu.prng_seed(seed_ref[0] + block_id * jnp.int32(1103515245))
    bits = pltpu.bitcast(pltpu.prng_random_bits(y.shape), jnp.uint32)
    keep = bits >= _dropout_threshold(p_drop)
    scale = jnp.asarray(1.0 / (1.0 - p_drop), dtype=y.dtype)
    o_ref[...] = jnp.where(keep, y * scale, jnp.zeros_like(y)).astype(o_ref.dtype)


def _add_pe_dropout_mask_kernel(x_ref, pe_ref, bits_ref, o_ref, *, p_drop):
    """Training-mode fallback: dropout from pre-generated random bits (works
    on non-TPU backends / interpret mode where the HW PRNG has no lowering)."""
    y = x_ref[...] + pe_ref[...]
    keep = bits_ref[...] >= _dropout_threshold(p_drop)
    scale = jnp.asarray(1.0 / (1.0 - p_drop), dtype=y.dtype)
    o_ref[...] = jnp.where(keep, y * scale, jnp.zeros_like(y)).astype(o_ref.dtype)


# ----------------------------------------------------------------------------
# Tiling helpers
# ----------------------------------------------------------------------------
def _pick_tile(dim, max_tile, multiple):
    """Largest divisor of `dim` that is <= max_tile and a multiple of `multiple`.
    Falls back to the full dim (legal via the 'equals full array dim' rule)."""
    if dim <= max_tile:
        return dim
    best = 0
    t = multiple
    while t <= max_tile:
        if dim % t == 0:
            best = t
        t += multiple
    return best if best > 0 else dim


# ----------------------------------------------------------------------------
# Wrapper
# ----------------------------------------------------------------------------
def positional_encoding_forward(x, pe, *, dropout_p=0.1, training=False,
                                seed=0, block_seq=2048, use_hw_prng=None):
    """x: (B, S, D), pe: (max_len, D) with max_len >= S."""
    B, S, D = x.shape
    max_len, D_pe = pe.shape
    assert D == D_pe and S <= max_len

    # Match pe dtype to x (halves pe traffic / VMEM for bf16 activations) and
    # slice to the used rows so a full-seq block is a legal "full dim" block.
    pe = pe[:S].astype(x.dtype)

    itemsize = jnp.dtype(x.dtype).itemsize
    sublane = {1: 32, 2: 16, 4: 8}.get(itemsize, 8)

    # Tile sizing: big tiles amortize the ~0.35us/step overhead, but keep the
    # double-buffered working set comfortably under v7x's 64 MiB VMEM.
    row_bytes = max(1, D * itemsize)
    max_ts = max(sublane, min(block_seq, (2 << 20) // row_bytes))   # ~2 MiB seq slab
    ts = _pick_tile(S, min(max_ts, S), sublane)
    max_bb = max(1, (4 << 20) // max(1, ts * row_bytes))            # ~4 MiB x/out tile
    Bb = _pick_tile(B, min(max_bb, B), 1)

    # Grid: seq OUTER, batch INNER -> pe's block index is constant across the
    # inner (batch) iterations, so its DMA is not re-issued per batch block.
    grid = (S // ts, B // Bb)

    # index_maps take (*grid_idx, *scalar_prefetch_refs); trailing refs ignored.
    x_spec = pl.BlockSpec((Bb, ts, D), lambda s, b, *_: (b, s, 0))
    pe_spec = pl.BlockSpec((ts, D), lambda s, b, *_: (s, 0))
    out_spec = pl.BlockSpec((Bb, ts, D), lambda s, b, *_: (b, s, 0))
    out_shape = jax.ShapeDtypeStruct((B, S, D), x.dtype)

    x_tile_bytes = Bb * ts * row_bytes
    pe_tile_bytes = ts * row_bytes

    def cparams(n_big_streams):
        # double-buffered big streams + double-buffered pe tile + slack
        est = 2 * n_big_streams * x_tile_bytes + 2 * pe_tile_bytes + (2 << 20)
        return pltpu.CompilerParams(
            dimension_semantics=("parallel", "parallel"),
            vmem_limit_bytes=int(min(max(est, 32 << 20), 60 << 20)))

    apply_dropout = training and dropout_p > 0.0
    if not apply_dropout:
        return pl.pallas_call(
            _add_pe_kernel,
            out_shape=out_shape,
            grid=grid,
            in_specs=[x_spec, pe_spec],
            out_specs=out_spec,
            compiler_params=cparams(2),
        )(x, pe)

    if dropout_p >= 1.0:
        return jnp.zeros_like(x)

    if use_hw_prng is None:
        use_hw_prng = jax.devices()[0].platform == "tpu"

    if use_hw_prng:
        kernel = functools.partial(_add_pe_dropout_hw_kernel, p_drop=float(dropout_p))
        grid_spec = pltpu.PrefetchScalarGridSpec(
            num_scalar_prefetch=1,
            grid=grid,
            in_specs=[x_spec, pe_spec],
            out_specs=out_spec,
        )
        seed_arr = jnp.asarray([seed], dtype=jnp.int32)
        return pl.pallas_call(
            kernel,
            out_shape=out_shape,
            grid_spec=grid_spec,
            compiler_params=cparams(2),
        )(seed_arr, x, pe)

    # Fallback for non-TPU backends / interpret mode: stream host-generated
    # random bits (the TPU hardware PRNG primitives have no CPU lowering).
    bits = jax.random.bits(jax.random.PRNGKey(seed), (B, S, D), dtype=jnp.uint32)
    kernel = functools.partial(_add_pe_dropout_mask_kernel, p_drop=float(dropout_p))
    bits_spec = pl.BlockSpec((Bb, ts, D), lambda s, b: (b, s, 0))
    return pl.pallas_call(
        kernel,
        out_shape=out_shape,
        grid=grid,
        in_specs=[x_spec, pe_spec, bits_spec],
        out_specs=out_spec,
        compiler_params=cparams(3),
    )(x, pe, bits)


class PositionalEncoding:
    """Mirror of the PyTorch module's forward semantics."""

    def __init__(self, d_model, dropout=0.1, max_len=5000):
        self.dropout_p = float(dropout)
        self.pe = make_positional_encoding(max_len, d_model)   # (max_len, d_model)

    def __call__(self, x, *, training=False, seed=0):
        return positional_encoding_forward(
            x, self.pe, dropout_p=self.dropout_p, training=training, seed=seed)


# ----------------------------------------------------------------------------
if __name__ == "__main__":
    B, S, D, MAX_LEN = 2, 8, 128, 64
    P_DROP = 0.1

    key = jax.random.PRNGKey(0)
    x = jax.random.normal(key, (B, S, D), jnp.float32)

    module = PositionalEncoding(D, dropout=P_DROP, max_len=MAX_LEN)
    ref = x + module.pe[None, :S, :].astype(x.dtype)

    # ---- eval mode (dropout inactive): exact match against reference -------
    out_eval = jax.block_until_ready(module(x, training=False))
    assert out_eval.shape == (B, S, D)
    assert jnp.allclose(out_eval, ref, atol=1e-6, rtol=1e-6), "eval mismatch"

    # ---- training mode: kept elements must equal (x+pe)/(1-p), rest zero ---
    # TODO(synk): dropout uses the TPU hardware PRNG (or a jax.random bit
    # stream off-TPU), so the random stream differs from torch's RNG while the
    # Bernoulli(p) / inverted-scaling semantics match.
    out_train = jax.block_until_ready(module(x, training=True, seed=0))
    assert out_train.shape == (B, S, D)
    kept = out_train != 0.0
    assert jnp.allclose(jnp.where(kept, out_train, 0.0),
                        jnp.where(kept, ref / (1.0 - P_DROP), 0.0),
                        atol=1e-5, rtol=1e-5), "training mismatch on kept elems"
    drop_frac = 1.0 - float(jnp.mean(kept.astype(jnp.float32)))
    assert 0.0 <= drop_frac <= 0.4, f"dropout fraction implausible: {drop_frac}"

    print("KERNEL_OK")
</pallas_src>

<mosaic_0001>
module attributes {stable_mosaic.version = 11 : i64} {
  func.func @_add_pe_kernel(%arg0: i32, %arg1: i32, %arg2: memref<2x8x128xf32, #tpu.memory_space<vmem>>, %arg3: memref<8x128xf32, #tpu.memory_space<vmem>>, %arg4: memref<2x8x128xf32, #tpu.memory_space<vmem>>) attributes {dimension_semantics = [#tpu.dimension_semantics<parallel>, #tpu.dimension_semantics<parallel>], iteration_bounds = array<i64: 1, 1>, scalar_prefetch = 0 : i64, scratch_operands = 0 : i64, tpu.core_type = #tpu.core_type<tc>, window_params = [{transform_indices = @transform_0, window_bounds = array<i64: 2, 8, 128>}, {transform_indices = @transform_1, window_bounds = array<i64: 8, 128>}, {transform_indices = @transform_2, window_bounds = array<i64: 2, 8, 128>}]} {
    %c0 = arith.constant 0 : index
    %c0_0 = arith.constant 0 : index
    %c0_1 = arith.constant 0 : index
    %0 = vector.load %arg2[%c0, %c0_0, %c0_1] : memref<2x8x128xf32, #tpu.memory_space<vmem>>, vector<2x8x128xf32>
    %c0_2 = arith.constant 0 : index
    %c0_3 = arith.constant 0 : index
    %1 = vector.load %arg3[%c0_2, %c0_3] : memref<8x128xf32, #tpu.memory_space<vmem>>, vector<8x128xf32>
    %2 = vector.shape_cast %1 : vector<8x128xf32> to vector<1x8x128xf32>
    %3 = vector.broadcast %2 : vector<1x8x128xf32> to vector<2x8x128xf32>
    %4 = arith.addf %0, %3 : vector<2x8x128xf32>
    %c0_4 = arith.constant 0 : index
    %c0_5 = arith.constant 0 : index
    %c0_6 = arith.constant 0 : index
    %5 = vector.load %arg4[%c0_4, %c0_5, %c0_6] : memref<2x8x128xf32, #tpu.memory_space<vmem>>, vector<2x8x128xf32>
    tpu.vector_store %arg4[%c0_4, %c0_5, %c0_6], %4 {strides = array<i32>} : memref<2x8x128xf32, #tpu.memory_space<vmem>>, vector<2x8x128xf32>,
    return
  }
  func.func @transform_0(%arg0: i32, %arg1: i32) -> (i32, i32, i32) {
    %c0_i32 = arith.constant 0 : i32
    %c0_i32_0 = arith.constant 0 : i32
    return %arg1, %arg0, %c0_i32 : i32, i32, i32
  }
  func.func @transform_1(%arg0: i32, %arg1: i32) -> (i32, i32) {
    %c0_i32 = arith.constant 0 : i32
    %c0_i32_0 = arith.constant 0 : i32
    return %arg0, %c0_i32 : i32, i32
  }
  func.func @transform_2(%arg0: i32, %arg1: i32) -> (i32, i32, i32) {
    %c0_i32 = arith.constant 0 : i32
    %c0_i32_0 = arith.constant 0 : i32
    return %arg1, %arg0, %c0_i32 : i32, i32, i32
  }
}

</mosaic_0001>

<bundles_post_ra>
// kernel: tpu_custom_call.1
= control target key start
LH: loop header
LB: loop body
LE: loop exit
PB: predicated region body
PF: predicated region fallthrough
CT: control target
= control target key end

     0   :  { %7 = vsyncpa [#allocation3], 0  ;;  %s202_s0 = inlined_call_operand.hbm [shape: f32[2,8,128], index: 0, kind: input, shape index: {}]   ;;  %s203_s1 = inlined_call_operand.hbm [shape: f32[8,128], index: 1, kind: input, shape index: {}]   ;;  %s204_s2 = inlined_call_operand.hbm [shape: f32[2,8,128], index: 2, kind: output, shape index: {}]  }
   0x1   :  { %8 = vsyncpa [#allocation6], 0 }
   0x2   :  { %9 = vsyncpa [#allocation4], 0  ;;  %s140_s9 = smov [#allocation2]   ;;  %s68_s13 = scalar_lea.hbm %s202_s0, 256 }
   0x3   :  { %s15_s10 = sshll.u32 %s140_s9, 4  ;;  %p69_p0 = scmp.ne.s32.totalorder %s202_s0, %s68_s13  ;;  %s16_s10 = int_to_ptr.vmem [resolvable:$true] %s15_s10 }
   0x4   :  { %p72_p1 = scmp.lt.u32.totalorder %s68_s13, %s202_s0 }
   0x6   :  { %p74_p2 = pnand %p72_p1, %p69_p0 }
   0x8   :  { %77 = shalt.err (!%p74_p2)
}
   0x9   :  { %s78_s18 = scalar_lea.vmem %s16_s10, 256  ;;  %p83_p4 = scmp.lt.s32.totalorder %s16_s10, %s16_s10 }
   0xa   :  { %p79_p3 = scmp.ne.s32.totalorder %s16_s10, %s78_s18  ;;  %p84_p5 = scmp.lt.s32.totalorder %s78_s18, %s78_s18 }
   0xc   :  { %p85_p6 = por %p84_p5, %p83_p4 }
   0xe   :  { %p86_p7 = pnand %p85_p6, %p79_p3 }
  0x10   :  { %89 = shalt.err (!%p86_p7)
}
  0x11   :  { %s141_s19 = smov 128   ;;  %s142_s20 = smov 8  }
  0x12   :  { %21 = dma.hbm_to_vmem [thread:$0]  %s202_s0, 256, %s16_s10, [#allocation3], %s141_s19, %s141_s19, %s142_s20  }
  0x13   :  { %s143_s23 = smov [#allocation5]   ;;  %s90_s27 = scalar_lea.hbm %s203_s1, 128 }
  0x14   :  { %s28_s24 = sshll.u32 %s143_s23, 4  ;;  %p91_p8 = scmp.ne.s32.totalorder %s203_s1, %s90_s27  ;;  %s29_s24 = int_to_ptr.vmem [resolvable:$true] %s28_s24 }
  0x15   :  { %p94_p9 = scmp.lt.u32.totalorder %s90_s27, %s203_s1 }
  0x17   :  { %p96_p10 = pnand %p94_p9, %p91_p8 }
  0x19   :  { %99 = shalt.err (!%p96_p10)
}
  0x1a   :  { %s100_s4 = scalar_lea.vmem %s29_s24, 128  ;;  %p105_p12 = scmp.lt.s32.totalorder %s29_s24, %s29_s24 }
  0x1b   :  { %p101_p11 = scmp.ne.s32.totalorder %s29_s24, %s100_s4  ;;  %p106_p13 = scmp.lt.s32.totalorder %s100_s4, %s100_s4 }
  0x1d   :  { %p107_p0 = por %p106_p13, %p105_p12 }
  0x1f   :  { %p108_p1 = pnand %p107_p0, %p101_p11 }
  0x21   :  { %111 = shalt.err (!%p108_p1)
}
  0x22   :  { %31 = dma.hbm_to_vmem [thread:$0]  %s203_s1, 128, %s29_s24, [#allocation6]  }
  0x23   :  { %134 = dma.done.wait [#allocation3], 256  }
  0x24   :  { %135 = vsyncadd [#allocation3], 4294967040 }
  0x25   :  { %136 = dma.done.wait [#allocation6], 128  }
  0x26   :  { %137 = vsyncadd [#allocation6], 4294967168  ;;  %s144_s6 = smov [#allocation7]   ;;  %v38_v0 = vld [vmem:[#allocation2] sm:$0xff]  ;;  %v40_v1 = vld [vmem:[#allocation5] sm:$0xff] }
  0x27   :  { %s50_s7 = sshll.u32 %s144_s6, 4  ;;  %v39_v2 = vld [vmem:[#allocation2 + $0x8] sm:$0xff]  ;;  %v41_v3 = vadd.f32 %v40_v1, %v38_v0  ;;  %s51_s7 = int_to_ptr.vmem [resolvable:$true] %s50_s7 }
  0x28   :  { %v42_v4 = vadd.f32 %v40_v1, %v39_v2  ;;  %s112_s8 = scalar_lea.vmem %s51_s7, 256  ;;  %p117_p3 = scmp.lt.s32.totalorder %s51_s7, %s51_s7 }
  0x29   :  { %43 = vst [vmem:[#allocation7] sm:$0xff] %v41_v3  ;;  %p113_p2 = scmp.ne.s32.totalorder %s51_s7, %s112_s8  ;;  %p118_p4 = scmp.lt.s32.totalorder %s112_s8, %s112_s8 }
  0x2a   :  { %44 = vst [vmem:[#allocation7 + $0x8] sm:$0xff] %v42_v4 }
  0x2b   :  { %p119_p5 = por %p118_p4, %p117_p3 }
  0x2d   :  { %p120_p6 = pnand %p119_p5, %p113_p2 }
  0x2f   :  { %123 = shalt.err (!%p120_p6)
}
  0x30   :  { %s124_s10 = scalar_lea.hbm %s204_s2, 256 }
  0x31   :  { %p125_p7 = scmp.ne.s32.totalorder %s204_s2, %s124_s10  ;;  %p128_p8 = scmp.lt.u32.totalorder %s124_s10, %s204_s2 }
  0x33   :  { %p130_p9 = pnand %p128_p8, %p125_p7 }
  0x35   :  { %133 = shalt.err (!%p130_p9)
}
  0x36   :  { %56 = dma.vmem_to_hbm [thread:$0]  %s51_s7, 256, %s204_s2, [#allocation4], %s141_s19, %s141_s19, %s142_s20  }
  0x37   :  { %138 = dma.done.wait [#allocation4], 256  }
  0x38   :  { %139 = vsyncadd [#allocation4], 4294967040 }
  0x39   :  { %60 = vsyncpa [#allocation3], 1 }
  0x3a   :  { %61 = vsyncpa [#allocation6], 1 }
  0x3b   :  { %62 = vsyncpa [#allocation4], 1 }

</bundles_post_ra>
